<compile_context>
chip_gen: v7x
topology: tpu7x:2x2x1
jax: 0.10.0
libtpu: 0.0.40
codegen_flags: <defaults>
</compile_context>

<pallas_src>
import functools

import numpy as np
import jax
import jax.numpy as jnp
from jax.experimental import pallas as pl
from jax.experimental.pallas import tpu as pltpu

EMB = 128          # emb_size (scaled down from 256 for a small example)
TEXTDIM = 768      # bert-base hidden dim (as in the module's __init__)
FPN_N = 3
SUB_STEP = 2
BN_EPS = 1e-5
THRES_PHI = 0.5
NUM_ANCH = 9 * 5   # fcn head real output width (padded to 128 lanes in the kernel)
LANE_PAD = 128


def _round_up(x, m):
    return ((x + m - 1) // m) * m


def _bf16(w):
    return w if w.dtype == jnp.bfloat16 else w.astype(jnp.bfloat16)


def _pick_tile(M, tile_m):
    # Prefer >=2 grid steps (v7x dual TensorCore), rows a multiple of 16 (bf16 tiles).
    tm = _round_up(max((M + 1) // 2, 8), 16)
    tm = min(tile_m, tm, _round_up(M, 8))
    return max(tm, 8)


# --------------------------------------------------------------------------
# Pallas kernels
# --------------------------------------------------------------------------
def _mm_affine_kernel(*refs, n_in, act, l2norm):
    # y = act(sum_i x_i @ w_i + b); optional per-row L2 normalize.  bf16 MXU inputs,
    # fp32 accumulate / epilogue.
    xs = refs[:n_in]
    ws = refs[n_in:2 * n_in]
    b_ref = refs[2 * n_in]
    o_ref = refs[2 * n_in + 1]
    y = jnp.dot(xs[0][...].astype(jnp.bfloat16), ws[0][...],
                preferred_element_type=jnp.float32)
    for i in range(1, n_in):
        y = y + jnp.dot(xs[i][...].astype(jnp.bfloat16), ws[i][...],
                        preferred_element_type=jnp.float32)
    y = y + b_ref[...]
    if act == "relu":
        y = jnp.maximum(y, 0.0)
    if l2norm:
        ss = jnp.sum(y * y, axis=-1, keepdims=True)
        y = y * jax.lax.rsqrt(jnp.maximum(ss, 1e-24))   # == x / max(||x||, 1e-12)
    o_ref[...] = y.astype(o_ref.dtype)


def matmul_affine(xs, ws, b=None, *, act="relu", l2norm=False,
                  out_dtype=jnp.bfloat16, tile_m=2048):
    """Fused sum_i(rows_i @ w_i) + b -> act -> (optional) row L2-normalize."""
    M = xs[0].shape[0]
    N = ws[0].shape[1]
    if b is None:
        b = jnp.zeros((N,), jnp.float32)
    tm = _pick_tile(M, tile_m)
    grid_m = pl.cdiv(M, tm)
    in_specs = ([pl.BlockSpec((tm, x.shape[1]), lambda i: (i, 0)) for x in xs]
                + [pl.BlockSpec(w.shape, lambda i: (0, 0)) for w in ws]
                + [pl.BlockSpec((1, N), lambda i: (0, 0))])
    return pl.pallas_call(
        functools.partial(_mm_affine_kernel, n_in=len(xs), act=act, l2norm=l2norm),
        out_shape=jax.ShapeDtypeStruct((M, N), out_dtype),
        grid=(grid_m,),
        in_specs=in_specs,
        out_specs=pl.BlockSpec((tm, N), lambda i: (i, 0)),
        compiler_params=pltpu.CompilerParams(dimension_semantics=("parallel",)),
    )(*xs, *[_bf16(w) for w in ws], jnp.reshape(b, (1, N)).astype(jnp.float32))


def _mlp2_kernel(*refs, n_in, act2, l2norm):
    # relu(sum_i x_i @ w1_i + b1) @ w2 + b2, optional relu / row L2-normalize.
    xs = refs[:n_in]
    w1s = refs[n_in:2 * n_in]
    b1_ref, w2_ref, b2_ref, o_ref = refs[2 * n_in:2 * n_in + 4]
    h = jnp.dot(xs[0][...].astype(jnp.bfloat16), w1s[0][...],
                preferred_element_type=jnp.float32)
    for i in range(1, n_in):
        h = h + jnp.dot(xs[i][...].astype(jnp.bfloat16), w1s[i][...],
                        preferred_element_type=jnp.float32)
    h = jnp.maximum(h + b1_ref[...], 0.0)
    y = jnp.dot(h.astype(jnp.bfloat16), w2_ref[...],
                preferred_element_type=jnp.float32) + b2_ref[...]
    if act2 == "relu":
        y = jnp.maximum(y, 0.0)
    if l2norm:
        ss = jnp.sum(y * y, axis=-1, keepdims=True)
        y = y * jax.lax.rsqrt(jnp.maximum(ss, 1e-24))
    o_ref[...] = y.astype(o_ref.dtype)


def mlp2(xs, w1s, b1, w2, b2, *, act2="none", l2norm=False,
         out_dtype=jnp.bfloat16, tile_m=2048):
    M = xs[0].shape[0]
    Cmid = w1s[0].shape[1]
    N = w2.shape[1]
    tm = _pick_tile(M, tile_m)
    grid_m = pl.cdiv(M, tm)
    in_specs = ([pl.BlockSpec((tm, x.shape[1]), lambda i: (i, 0)) for x in xs]
                + [pl.BlockSpec(w.shape, lambda i: (0, 0)) for w in w1s]
                + [pl.BlockSpec((1, Cmid), lambda i: (0, 0)),
                   pl.BlockSpec(w2.shape, lambda i: (0, 0)),
                   pl.BlockSpec((1, N), lambda i: (0, 0))])
    return pl.pallas_call(
        functools.partial(_mlp2_kernel, n_in=len(xs), act2=act2, l2norm=l2norm),
        out_shape=jax.ShapeDtypeStruct((M, N), out_dtype),
        grid=(grid_m,),
        in_specs=in_specs,
        out_specs=pl.BlockSpec((tm, N), lambda i: (i, 0)),
        compiler_params=pltpu.CompilerParams(dimension_semantics=("parallel",)),
    )(*xs, *[_bf16(w) for w in w1s],
      jnp.reshape(b1, (1, Cmid)).astype(jnp.float32),
      _bf16(w2), jnp.reshape(b2, (1, N)).astype(jnp.float32))


def _strip_rows(H, W, target=256):
    # largest strip (multiple of W, divides H*W) with roughly <= `target` rows
    k = max(1, min(H, target // W))
    while H % k:
        k -= 1
    return W * k


def _fused_1x1_3x3_kernel(x1_ref, x2_ref, w1a_ref, w1b_ref, b1_ref, w3_ref, b3_ref,
                          o_ref, hc_ref, hl_ref, hr_ref, *, H, W, S):
    # conv1x1(E+E->E)+BN+ReLU then conv3x3(E->E, pad=1)+BN+ReLU, all in VMEM.
    # The 1x1 output is stored (bf16) into three y-padded planes: center, and
    # column-shifted left/right copies whose x-edge rows are zeroed at store time.
    # Every 3x3 tap is then an aligned (S, C) window load + one MXU matmul, and the
    # fp32 accumulator is strip-wise so it stays in registers.
    HW = H * W
    C = w1a_ref.shape[1]
    NP = (H + 2) * W
    zpad = jnp.zeros((W, C), jnp.bfloat16)
    for ref in (hc_ref, hl_ref, hr_ref):
        ref[0:W, :] = zpad
        ref[W + HW:NP, :] = zpad
    # column index of each row within a strip (strips start at multiples of W)
    col = jax.lax.broadcasted_iota(jnp.int32, (S, 1), 0) % W
    not_x0 = col != 0          # keep rows where x != 0      (left-tap plane)
    not_xw = col != (W - 1)    # keep rows where x != W-1    (right-tap plane)

    # ---- 1x1 + BN + ReLU, strip-wise; store the three bf16 planes ----
    for s0 in range(0, HW, S):
        x1 = x1_ref[0, s0:s0 + S, :].astype(jnp.bfloat16)
        x2 = x2_ref[0, s0:s0 + S, :].astype(jnp.bfloat16)
        h = jnp.dot(x1, w1a_ref[...], preferred_element_type=jnp.float32)
        h = h + jnp.dot(x2, w1b_ref[...], preferred_element_type=jnp.float32)
        h = jnp.maximum(h + b1_ref[...], 0.0)                       # (S, C) fp32
        hc_ref[W + s0:W + s0 + S, :] = h.astype(jnp.bfloat16)
        hl = jnp.where(not_x0, pltpu.roll(h, 1, 0), 0.0)            # h[., x-1]
        hl_ref[W + s0:W + s0 + S, :] = hl.astype(jnp.bfloat16)
        hr = jnp.where(not_xw, pltpu.roll(h, S - 1, 0), 0.0)        # h[., x+1]
        hr_ref[W + s0:W + s0 + S, :] = hr.astype(jnp.bfloat16)

    # ---- 3x3 + BN + ReLU, strip-wise fp32 accumulator kept in registers ----
    for s0 in range(0, HW, S):
        acc = jnp.zeros((S, C), jnp.float32)
        for kh in range(3):
            r0 = s0 + kh * W
            acc = acc + jnp.dot(hl_ref[r0:r0 + S, :], w3_ref[kh * 3 + 0],
                                preferred_element_type=jnp.float32)
            acc = acc + jnp.dot(hc_ref[r0:r0 + S, :], w3_ref[kh * 3 + 1],
                                preferred_element_type=jnp.float32)
            acc = acc + jnp.dot(hr_ref[r0:r0 + S, :], w3_ref[kh * 3 + 2],
                                preferred_element_type=jnp.float32)
        y = jnp.maximum(acc + b3_ref[...], 0.0)
        o_ref[0, s0:s0 + S, :] = y.astype(o_ref.dtype)


def fused_cbr1x1_cbr3x3(p1, p3, x1_bhwc, x2_bhwc):
    """conv1x1(2E->E)+BN+ReLU -> conv3x3(E->E)+BN+ReLU on two channel-split inputs."""
    B, H, W, C = x1_bhwc.shape
    HW = H * W
    NP = (H + 2) * W
    S = _strip_rows(H, W)
    x1 = x1_bhwc.reshape(B, HW, C)
    x2 = x2_bhwc.reshape(B, HW, C)
    kern = functools.partial(_fused_1x1_3x3_kernel, H=H, W=W, S=S)
    out = pl.pallas_call(
        kern,
        out_shape=jax.ShapeDtypeStruct((B, HW, C), jnp.bfloat16),
        grid=(B,),
        in_specs=[
            pl.BlockSpec((1, HW, C), lambda b: (b, 0, 0)),
            pl.BlockSpec((1, HW, C), lambda b: (b, 0, 0)),
            pl.BlockSpec((C, C), lambda b: (0, 0)),
            pl.BlockSpec((C, C), lambda b: (0, 0)),
            pl.BlockSpec((1, C), lambda b: (0, 0)),
            pl.BlockSpec((9, C, C), lambda b: (0, 0, 0)),
            pl.BlockSpec((1, C), lambda b: (0, 0)),
        ],
        out_specs=pl.BlockSpec((1, HW, C), lambda b: (b, 0, 0)),
        scratch_shapes=[pltpu.VMEM((NP, C), jnp.bfloat16),
                        pltpu.VMEM((NP, C), jnp.bfloat16),
                        pltpu.VMEM((NP, C), jnp.bfloat16)],
        compiler_params=pltpu.CompilerParams(dimension_semantics=("parallel",)),
    )(x1, x2, _bf16(p1["wa"]), _bf16(p1["wb"]),
      p1["b"].reshape(1, C).astype(jnp.float32),
      _bf16(p3["w3"]), p3["b"].reshape(1, C).astype(jnp.float32))
    return out.reshape(B, H, W, C)


def _l2norm_kernel(x_ref, o_ref):
    x = x_ref[...].astype(jnp.float32)
    ss = jnp.sum(x * x, axis=-1, keepdims=True)
    o_ref[...] = (x * jax.lax.rsqrt(jnp.maximum(ss, 1e-24))).astype(o_ref.dtype)


def l2_normalize_rows(x, *, out_dtype=jnp.bfloat16, tile_m=4096):
    M, C = x.shape
    tm = _pick_tile(M, tile_m)
    grid_m = pl.cdiv(M, tm)
    return pl.pallas_call(
        _l2norm_kernel,
        out_shape=jax.ShapeDtypeStruct((M, C), out_dtype),
        grid=(grid_m,),
        in_specs=[pl.BlockSpec((tm, C), lambda i: (i, 0))],
        out_specs=pl.BlockSpec((tm, C), lambda i: (i, 0)),
        compiler_params=pltpu.CompilerParams(dimension_semantics=("parallel",)),
    )(x)


def _cosine_max_kernel(a_ref, b_ref, o_ref):
    # cosine(st_token_i, word_j) -> max over j -> threshold; one batch per grid step.
    a = a_ref[...].astype(jnp.float32)                     # (1, Ts, K)
    b = b_ref[...].astype(jnp.float32)                     # (1, T, K)
    a_n = a * jax.lax.rsqrt(jnp.maximum(jnp.sum(a * a, -1, keepdims=True), 1e-16))
    b_n = b * jax.lax.rsqrt(jnp.maximum(jnp.sum(b * b, -1, keepdims=True), 1e-16))
    sim = jnp.einsum('bik,bjk->bij', a_n, b_n, preferred_element_type=jnp.float32)
    score = jnp.max(sim, axis=-1, keepdims=True)           # (1, Ts, 1)
    o_ref[...] = jnp.where(score < THRES_PHI, 0.0, score)


def cosine_max_threshold(a, b):
    B, Ts, K = a.shape
    T = b.shape[1]
    return pl.pallas_call(
        _cosine_max_kernel,
        out_shape=jax.ShapeDtypeStruct((B, Ts, 1), jnp.float32),
        grid=(B,),
        in_specs=[pl.BlockSpec((1, Ts, K), lambda i: (i, 0, 0)),
                  pl.BlockSpec((1, T, K), lambda i: (i, 0, 0))],
        out_specs=pl.BlockSpec((1, Ts, 1), lambda i: (i, 0, 0)),
        compiler_params=pltpu.CompilerParams(dimension_semantics=("parallel",)),
    )(a.astype(jnp.float32), b.astype(jnp.float32))


# --------------------------------------------------------------------------
# Thin channels-last wrappers / plain-JAX glue
# --------------------------------------------------------------------------
def cbr1x1(p, x_bhwc, act="relu"):
    B, H, W, Cin = x_bhwc.shape
    C = p["w"].shape[1]
    out = matmul_affine([x_bhwc.reshape(B * H * W, Cin)], [p["w"]], p["b"], act=act)
    return out.reshape(B, H, W, C)


def cbr1x1_2in(p, x1_bhwc, x2_bhwc, act="relu"):
    B, H, W, C = x1_bhwc.shape
    N = p["wa"].shape[1]
    out = matmul_affine([x1_bhwc.reshape(B * H * W, C), x2_bhwc.reshape(B * H * W, C)],
                        [p["wa"], p["wb"]], p["b"], act=act)
    return out.reshape(B, H, W, N)


def fcn_head(p, x1_bhwc, x2_bhwc):
    # CBR(2E->E) + Conv1x1(E->45, padded to 128 lanes) fused, channel-split inputs.
    B, H, W, C = x1_bhwc.shape
    out = mlp2([x1_bhwc.reshape(B * H * W, C), x2_bhwc.reshape(B * H * W, C)],
               [p["w1a"], p["w1b"]], p["b1"], p["w2"], p["b2"],
               act2="none", out_dtype=jnp.float32)
    return out[:, :NUM_ANCH].reshape(B, H, W, NUM_ANCH)


def single_conf_head(p, x1_bhwc, x2_bhwc):
    B, H, W, C = x1_bhwc.shape
    out = matmul_affine([x1_bhwc.reshape(B * H * W, C), x2_bhwc.reshape(B * H * W, C)],
                        [p["wa"], p["wb"]], p["b"], act="relu",
                        out_dtype=jnp.bfloat16)
    return out[:, 0].astype(jnp.float32).reshape(B, H * W)


def maxpool2x2(x_bhwc):
    B, H, W, C = x_bhwc.shape
    return x_bhwc.reshape(B, H // 2, 2, W // 2, 2, C).max(axis=(2, 4))


def upsample2x(x_bhwc):
    return jnp.repeat(jnp.repeat(x_bhwc, 2, axis=1), 2, axis=2)


def generate_coord_tokens(batch, height, width):
    xv, yv = jnp.meshgrid(jnp.arange(height), jnp.arange(width), indexing="ij")
    xv = xv.astype(jnp.float32)
    yv = yv.astype(jnp.float32)
    xv_min = (xv * 2 - width) / width
    yv_min = (yv * 2 - height) / height
    xv_max = ((xv + 1) * 2 - width) / width
    yv_max = ((yv + 1) * 2 - height) / height
    xv_ctr = (xv_min + xv_max) / 2
    yv_ctr = (yv_min + yv_max) / 2
    hmap = jnp.ones((height, width), jnp.float32) * (1.0 / height)
    wmap = jnp.ones((height, width), jnp.float32) * (1.0 / width)
    coord = jnp.stack([xv_min, yv_min, xv_max, yv_max, xv_ctr, yv_ctr, hmap, wmap], -1)
    coord = jnp.broadcast_to(coord[None], (batch, height, width, 8))
    return coord.reshape(batch, height * width, 8)


def st_grid_calculation_np(score, word_id_st_sent2wordlist, bbox_st_list,
                           st_list_bbox2word, visu_scale, image_scale):
    # TODO(synk): data-dependent host loop (the reference uses .item()/nonzero() host
    # loops too); kept on host rather than faking a Pallas scatter.
    B = score.shape[0]
    dividend = image_scale // visu_scale
    amap = np.zeros((B, visu_scale, visu_scale, 1), np.float32)
    for b in range(B):
        for ii in range(score.shape[1]):
            s = float(score[b, ii, 0])
            if s == 0.0:
                continue
            idxs = np.nonzero(st_list_bbox2word[b] == (word_id_st_sent2wordlist[b, ii] + 1))[0]
            for jj in idxs:
                x1, y1, x2, y2 = bbox_st_list[b][jj]
                gxl = int(x1 // dividend)
                gxr = min(int(x2 // dividend + 1), visu_scale - 1)
                gyt = int(y1 // dividend)
                gyb = min(int(y2 // dividend + 1), visu_scale - 1)
                amap[b, gyt:gyb, gxl:gxr] = s
    for b in range(B):
        if np.count_nonzero(amap[b]) != 0:
            t = amap[b].reshape(-1, 1) * 9.0
            t = np.exp(t - t.max())
            t = t / t.sum()
            amap[b] = t.reshape(visu_scale, visu_scale, 1)
    return amap


def cross_att_blocked_standin(visu, txt, coord, cos_tw, cos_tv, word_mask):
    # TODO(synk): cross_att_blocked is an external module whose definition was not
    # provided; identity pass-through stand-in with empty cosine-region lists.
    return visu, txt, [], [], cos_tw, cos_tv


# --------------------------------------------------------------------------
# Parameter init (deterministic, synthetic; BN folded into weights, bf16 weights)
# --------------------------------------------------------------------------
def _fold_bn(gamma, beta, mean, var):
    scale = gamma / jnp.sqrt(var + BN_EPS)
    shift = beta - mean * scale
    return scale, shift


def _bn_params(key, cout):
    kg, kb, km, kv = jax.random.split(key, 4)
    gamma = 1.0 + 0.05 * jax.random.normal(kg, (cout,), jnp.float32)
    beta = 0.05 * jax.random.normal(kb, (cout,), jnp.float32)
    mean = 0.05 * jax.random.normal(km, (cout,), jnp.float32)
    var = 1.0 + 0.1 * jnp.abs(jax.random.normal(kv, (cout,), jnp.float32))
    return _fold_bn(gamma, beta, mean, var)


def init_cbr1x1(key, cin, cout, pad_to=None, split=False):
    # TODO(synk): original module is built with leaky=False, i.e. plain ReLU.
    kw, kbn = jax.random.split(key)
    w = 0.05 * jax.random.normal(kw, (cin, cout), jnp.float32)
    scale, shift = _bn_params(kbn, cout)
    wf = w * scale          # BN scale folded into the weight
    b = shift
    if pad_to is not None:
        wf = jnp.zeros((cin, pad_to), jnp.float32).at[:, :cout].set(wf)
        b = jnp.zeros((pad_to,), jnp.float32).at[:cout].set(b)
    wf = wf.astype(jnp.bfloat16)
    if split:
        half = cin // 2
        return {"wa": wf[:half], "wb": wf[half:], "b": b}
    return {"w": wf, "b": b}


def init_cbr3x3(key, cin, cout):
    kw, kbn = jax.random.split(key)
    w = 0.05 * jax.random.normal(kw, (3, 3, cin, cout), jnp.float32)
    scale, shift = _bn_params(kbn, cout)
    wf = (w * scale).astype(jnp.bfloat16).reshape(9, cin, cout)
    return {"w3": wf, "b": shift}


def init_linear(key, cin, cout, split=False):
    kw, kb = jax.random.split(key)
    w = (0.05 * jax.random.normal(kw, (cin, cout), jnp.float32)).astype(jnp.bfloat16)
    b = 0.05 * jax.random.normal(kb, (cout,), jnp.float32)
    if split:
        half = cin // 2
        return {"wa": w[:half], "wb": w[half:], "b": b}
    return {"w": w, "b": b}


def init_lang(key):
    k1, k2 = jax.random.split(key)
    l1 = init_linear(k1, TEXTDIM, EMB)
    l2 = init_linear(k2, EMB, EMB)
    return {"w1": l1["w"], "b1": l1["b"], "w2": l2["w"], "b2": l2["b"]}


def init_fcn_head(key, cin2, cmid, cout, pad_to=LANE_PAD):
    k1, k2, k3 = jax.random.split(key, 3)
    cbr = init_cbr1x1(k1, cin2, cmid, split=True)
    w2 = 0.05 * jax.random.normal(k2, (cmid, cout), jnp.float32)
    b2 = 0.05 * jax.random.normal(k3, (cout,), jnp.float32)
    w2p = jnp.zeros((cmid, pad_to), jnp.float32).at[:, :cout].set(w2).astype(jnp.bfloat16)
    b2p = jnp.zeros((pad_to,), jnp.float32).at[:cout].set(b2)
    return {"w1a": cbr["wa"], "w1b": cbr["wb"], "b1": cbr["b"], "w2": w2p, "b2": b2p}


def init_params(key):
    keys = iter(jax.random.split(key, 64))
    p = {}
    p["mapping_visu"] = init_cbr1x1(next(keys), 256, EMB)
    p["lang"] = init_lang(next(keys))
    p["txt_single_classifier"] = init_cbr1x1(next(keys), 2 * EMB, 1,
                                             pad_to=LANE_PAD, split=True)
    p["convmerge0_1x1"] = init_cbr1x1(next(keys), 2 * EMB, EMB, split=True)
    p["convmerge1_1x1"] = init_cbr1x1(next(keys), 2 * EMB, EMB, split=True)
    p["conv0_downsample"] = init_cbr1x1(next(keys), EMB, EMB)
    p["conv1_downsample"] = init_cbr1x1(next(keys), EMB, EMB)
    for name in ("fcn", "fcn_sub", "fcn_2sub"):
        p[name] = init_fcn_head(next(keys), 2 * EMB, EMB, NUM_ANCH)
    p["linear"], p["conv_1x1"], p["conv_3x3"] = [], [], []
    for _ in range(FPN_N * SUB_STEP):
        # TODO(synk): original hardcodes nn.Linear(1024, emb) sized to the
        # (unavailable) cross_att_blocked txt output; sized (2*emb -> emb) here.
        p["linear"].append(init_linear(next(keys), 2 * EMB, EMB, split=True))
        p["conv_1x1"].append(init_cbr1x1(next(keys), 2 * EMB, EMB, split=True))
        p["conv_3x3"].append(init_cbr3x3(next(keys), EMB, EMB))
    return p


# --------------------------------------------------------------------------
# Forward
# --------------------------------------------------------------------------
def cross_attention_head_forward(params, image, word_id, word_mask, word_st_position,
                                 bbox_st_list, word_id_st_sent, word_mask_st_sent,
                                 st_list_bbox2word,
                                 raw_fvisu_8x8, raw_fvisu_16x16, raw_fvisu_32,
                                 raw_fword, raw_fword_st_sent):
    # TODO(synk): Darknet visual backbone and BertModel text backbone are external
    # modules; their outputs are provided as synthetic inputs with the implied shapes.
    B = image.shape[0]
    img_scale = image.shape[2]
    T = word_id.shape[1]
    Ts = word_id_st_sent.shape[1]

    # --- CLS/SEP-stripping masks (reference builds them with host loops) ---
    n_word = jnp.sum((word_mask != 0).astype(jnp.int32), axis=1)
    n_st = jnp.sum((word_id_st_sent != 0).astype(jnp.int32), axis=1)
    tok = jnp.arange(T)[None, :]
    tok_s = jnp.arange(Ts)[None, :]
    mask_word_att = ((tok >= 1) & (tok < (n_word[:, None] - 1))).astype(jnp.float32)[..., None]
    mask_st_att = ((tok_s >= 1) & (tok_s < (n_st[:, None] - 1))).astype(jnp.float32)[..., None]
    raw_fword_attn = raw_fword * mask_word_att
    fword_st_masked = raw_fword_st_sent * mask_st_att

    # --- st relevance score: cosine sim, max over words, threshold (Pallas) ---
    st_score = cosine_max_threshold(fword_st_masked, raw_fword_attn)   # (B,Ts,1)

    # --- independent device work enqueued BEFORE the host sync so it overlaps ---
    lang = params["lang"]
    h2 = mlp2([raw_fword.reshape(B * T, TEXTDIM)], [lang["w1"]], lang["b1"],
              lang["w2"], lang["b2"], act2="relu", l2norm=True)        # mapping_lang + L2
    token_valid = (tok < n_word[:, None]).astype(jnp.bfloat16)[..., None]
    raw_fword_emb = h2.reshape(B, T, EMB) * token_valid                # bf16
    global_raw_fword = raw_fword_emb.astype(jnp.float32).mean(1).astype(jnp.bfloat16)

    # channels-last visual features (NCHW only at the module boundary)
    fv8 = jnp.transpose(raw_fvisu_8x8, (0, 2, 3, 1))      # (B,8,8,2E)
    fv16 = jnp.transpose(raw_fvisu_16x16, (0, 2, 3, 1))   # (B,16,16,E)
    fv32 = jnp.transpose(raw_fvisu_32, (0, 2, 3, 1))      # (B,32,32,256)
    H8, W8 = fv8.shape[1:3]
    H16, W16 = fv16.shape[1:3]
    H32, W32 = fv32.shape[1:3]
    # channel-pair max pool of the 8x8 map (commutes exactly with the positive
    # per-pixel amap scale applied below, so it can be issued before the sync)
    fv8p = fv8.reshape(B, H8, W8, EMB, 2).max(axis=-1)

    map_coord = generate_coord_tokens(B, H32, W32)
    map_coord_16 = generate_coord_tokens(B, H16, W16)
    map_coord_8 = generate_coord_tokens(B, H8, W8)

    # --- scene-text activation maps (host-side, data dependent) ---
    st_np = np.asarray(jax.device_get(st_score))
    wsp_np = np.asarray(jax.device_get(word_st_position))
    bbox_np = np.asarray(jax.device_get(bbox_st_list))
    b2w_np = np.asarray(jax.device_get(st_list_bbox2word))
    amap8 = jnp.asarray(st_grid_calculation_np(st_np, wsp_np, bbox_np, b2w_np, H8, img_scale))
    amap16 = jnp.asarray(st_grid_calculation_np(st_np, wsp_np, bbox_np, b2w_np, H16, img_scale))
    amap32 = jnp.asarray(st_grid_calculation_np(st_np, wsp_np, bbox_np, b2w_np, H32, img_scale))
    fv8a = (fv8p * amap8 + fv8p).astype(jnp.bfloat16)
    fv16a = (fv16 * amap16 + fv16).astype(jnp.bfloat16)
    fv32a = (fv32 * amap32 + fv32).astype(jnp.bfloat16)

    # --- mapping_visu (1x1+BN+ReLU) fused with channel L2-normalize (one kernel) ---
    mv = params["mapping_visu"]
    raw_fvisu_n = matmul_affine([fv32a.reshape(B * H32 * W32, fv32a.shape[-1])],
                                [mv["w"]], mv["b"], act="relu",
                                l2norm=True).reshape(B, H32, W32, EMB)
    raw_fvisu_16_n = l2_normalize_rows(fv16a.reshape(B * H16 * W16, EMB)).reshape(B, H16, W16, EMB)
    raw_fvisu_8_n = l2_normalize_rows(fv8a.reshape(B * H8 * W8, EMB)).reshape(B, H8, W8, EMB)

    map_fvisu_orig = raw_fvisu_n.reshape(B, H32 * W32, EMB)
    map_fvisu_16 = raw_fvisu_16_n.reshape(B, H16 * W16, EMB)
    map_fvisu_8 = raw_fvisu_8_n.reshape(B, H8 * W8, EMB)

    # --- FPN / cross-attention loop ---
    make_f, make_target_visu, make_target_txt = [], [], []
    cos_tw, cos_tv = None, None
    map_fvisu_add, map_coord_add, raw_fvisu_add = map_fvisu_orig, map_coord, raw_fvisu_n
    out_visu, merge_t, merge_f = 0.0, 0.0, None
    max_feature_32 = max_feature_16 = max_feature_8 = None
    out_region_32 = out_region_16 = out_region_8 = None
    att_n = 0
    for ff in range(FPN_N):
        for n in range(SUB_STEP):
            Hc, Wc = raw_fvisu_add.shape[1], raw_fvisu_add.shape[2]
            if ff != 0 or n != 0:
                out_visu = merge_f.reshape(B, Hc * Wc, EMB)
            visu_in = out_visu + map_fvisu_add
            txt_in = merge_t + raw_fword_emb
            out_visu, out_txt, cos_txt_region, cos_visu_region, cos_tw, cos_tv = \
                cross_att_blocked_standin(visu_in, txt_in, map_coord_add, cos_tw, cos_tv, word_mask)
            out_visu = out_visu + global_raw_fword[:, None, :]
            out_visu_bhwc = out_visu.reshape(B, Hc, Wc, EMB)
            # contrast_visu / contrast_txt are 0 in the reference forward
            merge_f = fused_cbr1x1_cbr3x3(params["conv_1x1"][att_n],
                                          params["conv_3x3"][att_n],
                                          raw_fvisu_add, out_visu_bhwc)
            lin = params["linear"][att_n]
            merge_t = matmul_affine([raw_fword_emb.reshape(B * T, EMB),
                                     out_txt.reshape(B * T, EMB)],
                                    [lin["wa"], lin["wb"]], lin["b"],
                                    act="none").reshape(B, T, EMB)
            make_target_visu.extend(cos_visu_region)
            make_target_txt.extend(cos_txt_region)
            make_f.append(merge_f)
            att_n += 1
        if ff == 0:
            max_feature_32 = make_f[0] + make_f[1]
            merge_f = maxpool2x2(cbr1x1(params["conv0_downsample"], max_feature_32))
            raw_fvisu_add, map_fvisu_add, map_coord_add = raw_fvisu_16_n, map_fvisu_16, map_coord_16
        elif ff == 1:
            max_feature_16 = make_f[2] + make_f[3]
            merge_f = maxpool2x2(cbr1x1(params["conv1_downsample"], max_feature_16))
            raw_fvisu_add, map_fvisu_add, map_coord_add = raw_fvisu_8_n, map_fvisu_8, map_coord_8
        if ff == FPN_N - 1:
            max_feature_8 = make_f[SUB_STEP * ff] + make_f[SUB_STEP * ff + 1]
            fpn16_up = upsample2x(max_feature_8)
            fpn16 = cbr1x1_2in(params["convmerge0_1x1"], max_feature_16, fpn16_up)
            fpn32_up = upsample2x(fpn16)
            fpn32 = cbr1x1_2in(params["convmerge1_1x1"], max_feature_32, fpn32_up)
            out_region_32 = fcn_head(params["fcn"], fpn32, raw_fvisu_n)
            out_region_16 = fcn_head(params["fcn_sub"], fpn16, raw_fvisu_16_n)
            out_region_8 = fcn_head(params["fcn_2sub"], max_feature_8, raw_fvisu_8_n)

    # --- single_conf classifier (shared weights), per level, channel-split inputs ---
    tsc = params["txt_single_classifier"]
    single_conf = single_conf_head(tsc, max_feature_32, raw_fvisu_n)
    single_conf_16 = single_conf_head(tsc, max_feature_16, raw_fvisu_16_n)
    single_conf_8 = single_conf_head(tsc, max_feature_8, raw_fvisu_8_n)

    out_feat = [jnp.transpose(out_region_32, (0, 3, 1, 2)),
                jnp.transpose(out_region_16, (0, 3, 1, 2)),
                jnp.transpose(out_region_8, (0, 3, 1, 2))]
    cosine_weights = [make_target_visu, make_target_txt, word_mask,
                      single_conf, single_conf_16, single_conf_8]
    return out_feat, cosine_weights


# --------------------------------------------------------------------------
if __name__ == "__main__":
    key = jax.random.PRNGKey(0)
    kp, k0, k1, k2, k3, k4, k5 = jax.random.split(key, 7)
    params = init_params(kp)

    B, T, Ts, NB, IMG = 2, 8, 6, 3, 256
    image = jax.random.normal(k0, (B, 3, IMG, IMG), jnp.float32)
    word_id = jnp.array([[101, 5, 6, 7, 8, 102, 0, 0],
                         [101, 9, 10, 102, 0, 0, 0, 0]], jnp.int32)
    word_mask = (word_id != 0).astype(jnp.int32)
    word_id_st_sent = jnp.array([[101, 11, 12, 102, 0, 0],
                                 [101, 13, 102, 0, 0, 0]], jnp.int32)
    word_mask_st_sent = (word_id_st_sent != 0).astype(jnp.int32)
    word_st_position = jnp.array([[0, 1, 2, 3, 0, 0],
                                  [0, 1, 2, 0, 0, 0]], jnp.int32)
    bbox_st_list = jnp.array([[[10, 20, 60, 80], [100, 40, 180, 120], [30, 150, 90, 220]],
                              [[5, 5, 50, 50], [120, 60, 200, 140], [0, 0, 0, 0]]], jnp.int32)
    st_list_bbox2word = jnp.array([[2, 3, 0], [2, 0, 0]], jnp.int32)

    # Synthetic backbone outputs (Darknet / BERT not available in-script).
    raw_fvisu_8x8 = 0.5 * jax.random.normal(k1, (B, 2 * EMB, 8, 8), jnp.float32)
    raw_fvisu_16x16 = 0.5 * jax.random.normal(k2, (B, EMB, 16, 16), jnp.float32)
    raw_fvisu_32 = 0.5 * jax.random.normal(k3, (B, 256, 32, 32), jnp.float32)
    raw_fword = 0.5 * jax.random.normal(k4, (B, T, TEXTDIM), jnp.float32)
    # make st-sentence tokens correlated with word tokens so the cosine threshold
    # path (score >= 0.5 -> activation map) is exercised
    raw_fword_st_sent = raw_fword[:, :Ts, :] * 0.9 + \
        0.05 * jax.random.normal(k5, (B, Ts, TEXTDIM), jnp.float32)

    out_feat, cosine_weights = cross_attention_head_forward(
        params, image, word_id, word_mask, word_st_position, bbox_st_list,
        word_id_st_sent, word_mask_st_sent, st_list_bbox2word,
        raw_fvisu_8x8, raw_fvisu_16x16, raw_fvisu_32, raw_fword, raw_fword_st_sent)

    for o in out_feat:
        jax.block_until_ready(o)
    for c in cosine_weights[3:]:
        jax.block_until_ready(c)

    assert out_feat[0].shape == (B, 45, 32, 32)
    assert out_feat[1].shape == (B, 45, 16, 16)
    assert out_feat[2].shape == (B, 45, 8, 8)
    assert cosine_weights[3].shape == (B, 32 * 32)
    assert cosine_weights[4].shape == (B, 16 * 16)
    assert cosine_weights[5].shape == (B, 8 * 8)
    print("KERNEL_OK")
</pallas_src>

<mosaic_0001>
module attributes {stable_mosaic.version = 11 : i64} {
  func.func @_cosine_max_kernel(%arg0: i32, %arg1: memref<1x6x768xf32, #tpu.memory_space<vmem>>, %arg2: memref<1x8x768xf32, #tpu.memory_space<vmem>>, %arg3: memref<1x6x1xf32, #tpu.memory_space<vmem>>) attributes {dimension_semantics = [#tpu.dimension_semantics<parallel>], iteration_bounds = array<i64: 2>, scalar_prefetch = 0 : i64, scratch_operands = 0 : i64, tpu.core_type = #tpu.core_type<tc>, window_params = [{transform_indices = @transform_0, window_bounds = array<i64: 1, 6, 768>}, {transform_indices = @transform_1, window_bounds = array<i64: 1, 8, 768>}, {transform_indices = @transform_2, window_bounds = array<i64: 1, 6, 1>}]} {
    %c0 = arith.constant 0 : index
    %c0_0 = arith.constant 0 : index
    %c0_1 = arith.constant 0 : index
    %0 = vector.load %arg1[%c0, %c0_0, %c0_1] : memref<1x6x768xf32, #tpu.memory_space<vmem>>, vector<1x6x768xf32>
    %c0_2 = arith.constant 0 : index
    %c0_3 = arith.constant 0 : index
    %c0_4 = arith.constant 0 : index
    %1 = vector.load %arg2[%c0_2, %c0_3, %c0_4] : memref<1x8x768xf32, #tpu.memory_space<vmem>>, vector<1x8x768xf32>
    %2 = arith.mulf %0, %0 : vector<1x6x768xf32>
    %cst = arith.constant dense<0.000000e+00> : vector<1x6xf32>
    %3 = vector.multi_reduction <add>, %2, %cst [2] : vector<1x6x768xf32> to vector<1x6xf32>
    %4 = vector.shape_cast %3 : vector<1x6xf32> to vector<1x6x1xf32>
    %cst_5 = arith.constant 1.000000e-16 : f32
    %5 = vector.broadcast %cst_5 : f32 to vector<1x6x1xf32>
    %6 = arith.maximumf %4, %5 : vector<1x6x1xf32>
    %7 = math.rsqrt %6 : vector<1x6x1xf32>
    %8 = vector.broadcast %7 : vector<1x6x1xf32> to vector<1x6x768xf32>
    %9 = arith.mulf %0, %8 : vector<1x6x768xf32>
    %10 = arith.mulf %1, %1 : vector<1x8x768xf32>
    %cst_6 = arith.constant dense<0.000000e+00> : vector<1x8xf32>
    %11 = vector.multi_reduction <add>, %10, %cst_6 [2] : vector<1x8x768xf32> to vector<1x8xf32>
    %12 = vector.shape_cast %11 : vector<1x8xf32> to vector<1x8x1xf32>
    %cst_7 = arith.constant 1.000000e-16 : f32
    %13 = vector.broadcast %cst_7 : f32 to vector<1x8x1xf32>
    %14 = arith.maximumf %12, %13 : vector<1x8x1xf32>
    %15 = math.rsqrt %14 : vector<1x8x1xf32>
    %16 = vector.broadcast %15 : vector<1x8x1xf32> to vector<1x8x768xf32>
    %17 = arith.mulf %1, %16 : vector<1x8x768xf32>
    "tpu.trace_start"() <{level = 10 : i32, message = "bik,bjk->bij"}> : () -> ()
    %cst_8 = arith.constant dense<0.000000e+00> : vector<1x6x8xf32>
    %18 = tpu.matmul %9, %17, %cst_8 {dimension_numbers = #tpu.dot_dimension_numbers<[2], [2], [1], [1], [0, 0, 0, 1, 1, 1], [0], [0]>} : vector<1x6x768xf32>, vector<1x8x768xf32>, vector<1x6x8xf32> -> vector<1x6x8xf32>
    "tpu.trace_stop"() : () -> ()
    %cst_9 = arith.constant dense<0xFF800000> : vector<1x6xf32>
    %19 = vector.multi_reduction <maximumf>, %18, %cst_9 [2] : vector<1x6x8xf32> to vector<1x6xf32>
    %20 = vector.shape_cast %19 : vector<1x6xf32> to vector<1x6x1xf32>
    %cst_10 = arith.constant 5.000000e-01 : f32
    %21 = vector.broadcast %cst_10 : f32 to vector<1x6x1xf32>
    %22 = arith.cmpf olt, %20, %21 : vector<1x6x1xf32>
    %cst_11 = arith.constant 0.000000e+00 : f32
    %23 = vector.broadcast %cst_11 : f32 to vector<1x6x1xf32>
    %24 = arith.select %22, %23, %20 : vector<1x6x1xi1>, vector<1x6x1xf32>
    %c0_12 = arith.constant 0 : index
    %c0_13 = arith.constant 0 : index
    %c0_14 = arith.constant 0 : index
    %25 = vector.load %arg3[%c0_12, %c0_13, %c0_14] : memref<1x6x1xf32, #tpu.memory_space<vmem>>, vector<1x6x1xf32>
    tpu.vector_store %arg3[%c0_12, %c0_13, %c0_14], %24 {strides = array<i32>} : memref<1x6x1xf32, #tpu.memory_space<vmem>>, vector<1x6x1xf32>,
    return
  }
  func.func @transform_0(%arg0: i32) -> (i32, i32, i32) {
    %c0_i32 = arith.constant 0 : i32
    %c0_i32_0 = arith.constant 0 : i32
    %c0_i32_1 = arith.constant 0 : i32
    return %arg0, %c0_i32, %c0_i32_0 : i32, i32, i32
  }
  func.func @transform_1(%arg0: i32) -> (i32, i32, i32) {
    %c0_i32 = arith.constant 0 : i32
    %c0_i32_0 = arith.constant 0 : i32
    %c0_i32_1 = arith.constant 0 : i32
    return %arg0, %c0_i32, %c0_i32_0 : i32, i32, i32
  }
  func.func @transform_2(%arg0: i32) -> (i32, i32, i32) {
    %c0_i32 = arith.constant 0 : i32
    %c0_i32_0 = arith.constant 0 : i32
    %c0_i32_1 = arith.constant 0 : i32
    return %arg0, %c0_i32, %c0_i32_0 : i32, i32, i32
  }
}

</mosaic_0001>

<bundles_post_ra>
// kernel: tpu_custom_call.1
= control target key start
LH: loop header
LB: loop body
LE: loop exit
PB: predicated region body
PF: predicated region fallthrough
CT: control target
= control target key end

     0   :  { %s555_s9 = smov 0   ;;  %s590_s0 = inlined_call_operand.vmem [shape: f32[2,6,768], index: 0, kind: input, shape index: {}]   ;;  %s591_s1 = inlined_call_operand.vmem [shape: f32[2,8,768], index: 1, kind: input, shape index: {}]   ;;  %s592_s2 = inlined_call_operand.vmem [shape: f32[2,6,1], index: 2, kind: output, shape index: {}]  }
   0x1 LB: > { %s506_s10 = sadd.s32 4294967295, %s538_s9   ;;  %p510_p0 = scmp.ge.s32.totalorder %s538_s9, 1  ;;  %s538_s9 = sphi %s555_s9, %s12_s9  }
   0x2   : > { %p122_p1 = scmp.lt.s32.totalorder %s538_s9, 3 }
   0x4   : > { %p123_p2 = pnand %p510_p0, %p122_p1 }
   0x5   : > { %p148_p3 = scmp.lt.s32.totalorder (!%p123_p2), %s506_s10, 1  ;;  %vm180_vm0 = vcmask (!%p123_p2), 1045504   ;;  %vm433_vm1 = vcmask (!%p123_p2), 62464   ;;  %vm439_vm2 = vcmask (!%p123_p2), 5120  }
   0x6   : > { %126 = sbr.rel (%p123_p2) target bundleno = 560 (0x230), region = 28 }
   0xd   : > { %s594_s10 = smov (!%p148_p3, %s506_s10), 1 }
   0xe   : > { %s519_s11 = smul.u32 48, %s594_s10  ;;  %s513_s18 = sshll.u32 %s594_s10, 3 }
   0xf   : > { %s161_s21 = scalar_lea.vmem %s592_s2, %s513_s18 }
  0x10   : > { %s157_s14 = scalar_lea.vmem %s591_s1, %s519_s11  ;;  %s152_s17 = scalar_lea.vmem %s590_s0, %s519_s11 }
  0x11   : > { %v168_v0 = vld [vmem:[%s157_s14] sm:$0xff]  ;;  %v169_v1 = vld [vmem:[%s157_s14 + $0x8] sm:$0xff]  ;;  %v170_v2 = vld [vmem:[%s157_s14 + $0x10] sm:$0xff] }
  0x12   : > { %v171_v3 = vld [vmem:[%s157_s14 + $0x18] sm:$0xff]  ;;  %v572_v4 = vld [vmem:[%s157_s14 + $0x20] sm:$0xff]  ;;  %v202_v5 = vmul.f32 %v168_v0, %v168_v0  ;;  %v203_v6 = vmul.f32 %v169_v1, %v169_v1  ;;  %v204_v7 = vmul.f32 %v170_v2, %v170_v2  ;;  %v163_v10 = vld [vmem:[%s152_s17 + $0x8] sm:$0x3f] }
  0x13   : > { %v205_v8 = vmul.f32 %v171_v3, %v171_v3  ;;  %v162_v9 = vld [vmem:[%s152_s17] sm:$0x3f]  ;;  %v164_v11 = vld [vmem:[%s152_s17 + $0x10] sm:$0x3f]  ;;  %v165_v13 = vld [vmem:[%s152_s17 + $0x18] sm:$0x3f]  ;;  %v175_v16 = vmul.f32 %v163_v10, %v163_v10  ;;  %v206_v19 = vmul.f32 %v572_v4, %v572_v4 }
  0x14   : > { %v208_v12 = vadd.f32 %v203_v6, %v202_v5  ;;  %v166_v14 = vld [vmem:[%s152_s17 + $0x20] sm:$0x3f]  ;;  %v174_v15 = vmul.f32 %v162_v9, %v162_v9  ;;  %v176_v17 = vmul.f32 %v164_v11, %v164_v11  ;;  %v173_v18 = vld [vmem:[%s157_s14 + $0x28] sm:$0xff]  ;;  %v177_v21 = vmul.f32 %v165_v13, %v165_v13 }
  0x15   : > { %v167_v20 = vld [vmem:[%s152_s17 + $0x28] sm:$0x3f]  ;;  %v178_v22 = vmul.f32 %v166_v14, %v166_v14  ;;  %v182_v25 = vsel %vm180_vm0, %v175_v16, 0.0  ;;  %v207_v28 = vmul.f32 %v173_v18, %v173_v18 }
  0x16   : > { %v209_v23 = vadd.f32 %v208_v12, %v204_v7  ;;  %v181_v24 = vsel %vm180_vm0, %v174_v15, 0.0  ;;  %v184_v26 = vsel %vm180_vm0, %v176_v17, 0.0  ;;  %v179_v30 = vmul.f32 %v167_v20, %v167_v20 }
  0x17   : > { %v183_v27 = vadd.f32 %v182_v25, %v181_v24  ;;  %v186_v31 = vsel %vm180_vm0, %v177_v21, 0.0  ;;  %v188_v34 = vsel %vm180_vm0, %v178_v22, 0.0 }
  0x18   : > { %v210_v29 = vadd.f32 %v209_v23, %v205_v8  ;;  %v190_v37 = vsel %vm180_vm0, %v179_v30, 0.0 }
  0x19   : > { %v185_v32 = vadd.f32 %v184_v26, %v183_v27 }
  0x1a   : > { %v211_v33 = vadd.f32 %v210_v29, %v206_v19 }
  0x1b   : > { %v187_v35 = vadd.f32 %v186_v31, %v185_v32 }
  0x1c   : > { %v212_v36 = vadd.f32 %v211_v33, %v207_v28 }
  0x1d   : > { %v189_v38 = vadd.f32 %v188_v34, %v187_v35 }
  0x1e   : > { %213 = vadd.xlane.f32.xlu0 %v212_v36 }
  0x1f   : > { %v191_v39 = vadd.f32 %v190_v37, %v189_v38 }
  0x22   : > { %192 = vadd.xlane.f32.xlu0 %v191_v39 }
  0xab   : > { %v214_v40 = vpop.xlane.xlu0 %213 }
  0xac   : > { %v215_v41 = vmax.f32 %v214_v40, 1e-16 }
  0xae   : > { %528 = vrsqrt.f32 %v215_v41 }
  0xaf   : > { %v193_v42 = vpop.xlane.xlu0 %192 }
  0xb0   : > { %v194_v43 = vmax.f32 %v193_v42, 1e-16 }
  0xb2   : > { %530 = vrsqrt.f32 %v194_v43 }
  0xb8   : > { %v529_v44 = vpop.eup %528 }
  0xb9   : > { %v218_v45 = vmul.f32 %v529_v44, %v169_v1  ;;  %v220_v46 = vmul.f32 %v529_v44, %v171_v3  ;;  %v217_v47 = vmul.f32 %v529_v44, %v168_v0  ;;  %v219_v48 = vmul.f32 %v529_v44, %v170_v2 }
  0xba   : > { %v222_v49 = vmul.f32 %v529_v44, %v173_v18  ;;  %v221_v55 = vmul.f32 %v529_v44, %v572_v4 }
  0xbb   : > { %223 = vmatprep.subr.mxu1 %v218_v45  ;;  %293 = vmatprep.subr.mxu0 %v220_v46 }
  0xbc   : > { %v531_v50 = vpop.eup %530  ;;  %224 = vmatpush1.xpose.msra.mxu1 %v217_v47  ;;  %294 = vmatpush1.xpose.msra.mxu0 %v219_v48 }
  0xbd   : > { %363 = vmatprep.subr.mxu0 %v222_v49  ;;  %v197_v51 = vmul.f32 %v531_v50, %v163_v10  ;;  %v199_v52 = vmul.f32 %v531_v50, %v165_v13  ;;  %v196_v53 = vmul.f32 %v531_v50, %v162_v9  ;;  %v198_v54 = vmul.f32 %v531_v50, %v164_v11 }
  0xbe   : > { %v201_v56 = vmul.f32 %v531_v50, %v167_v20  ;;  %v200_v57 = vmul.f32 %v531_v50, %v166_v14 }
  0xbf   : > { %287 = vmatprep.mubr.f32.mxu1 %v197_v51  ;;  %357 = vmatprep.mubr.f32.mxu0 %v199_v52 }
  0xc0   : > { %288 = vmatmul.mubr.f32.vlgmr.msra.gmra.mrb[0].mxu1 %v196_v53  ;;  %358 = vmatmul.mubr.f32.vlgmr.msra.gmra.mrb[0].mxu0 %v198_v54 }
  0xc1   : > { %364 = vmatpush1.xpose.msra.mxu0 %v221_v55  ;;  %427 = vmatprep.mubr.f32.mxu0 %v201_v56 }
  0xc8   : > { %428 = vmatmul.mubr.f32.vlgmr.msra.gmra.mrb[0].mxu0 %v200_v57 }
 0x193   : > { %v289_v58 = vpop.f32.mrb[0].mxu1 }
 0x194   : > { %v291_v59 = vpop.f32.mrb[1].mxu1 }
 0x19b   : > { %v429_v60 = vpop.f32.mrb[0].mxu0 }
 0x19c   : > { %v516_v61 = vadd.f32 %v429_v60, %v289_v58  ;;  %v431_v62 = vpop.f32.mrb[1].mxu0 }
 0x19e   : > { %v434_v63 = vsel %vm433_vm1, %v516_v61, -inf }
 0x19f   : > { %435 = vmax.xlane.f32.xlu1 %v434_v63 }
 0x22c   : > { %v436_v0 = vpop.xlane.xlu1 %435 }
 0x22d   : > { %vm437_vm3 = vcmp.lt.f32.partialorder %v436_v0, 0.5 }
 0x22e   : > { %v438_v1 = vsel %vm437_vm3, 0.0, %v436_v0 }
 0x22f   : > { %440 = vst.msk [vmem:[%s161_s21] sm:$0x3f] %vm439_vm2, %v438_v1 }
 0x230 PF: > { %s12_s9 = sadd.s32 1, %s538_s9  }
 0x231   : > { %p9_p4 = scmp.ge.s32.totalorder %s12_s9, 4  }
 0x233   :  { %11 = sbr.rel (!%p9_p4) target bundleno = 1 (0x1), region = 61 }

</bundles_post_ra>
